<compile_context>
chip_gen: v6e
topology: v6e:2x2x1
jax: 0.10.0
libtpu: 0.0.40
codegen_flags: <defaults>
</compile_context>

<pallas_src>
import jax
import jax.numpy as jnp
from jax import lax
from jax.experimental import pallas as pl
from jax.experimental.pallas import tpu as pltpu

INPUT_SIZE = 1
HIDDEN = 32
TIME_STEP = 10
B_PAD = 128          # lane width


def rnn_kernel(x_ref, w_ih_ref, w_hh_ref, b_ref, h0_ref, w_out_ref, b_out_ref,
               outs_ref, h_n_ref, hs_ref):
    """Elman RNN forward with hoisted output projection.

    x_ref    : (T, Bp)     f32
    w_ih_ref : (H, 1)      f32   (torch weight_ih_l0, (hidden, input))
    w_hh_ref : (H, H)      f32   (torch weight_hh_l0)
    b_ref    : (H, 1)      f32   (b_ih + b_hh, combined)
    h0_ref   : (H, Bp)     f32
    w_out_ref: (1, H)      f32   (torch Linear.weight)
    b_out_ref: (1, 1)      f32
    outs_ref : (1, T*Bp)   f32   out  (column t*Bp + b  ==  output[t, b])
    h_n_ref  : (H, Bp)     f32   out  (final hidden state)
    hs_ref   : (H, T*Bp)   f32   VMEM scratch (hidden-state history)
    """
    T, Bp = x_ref.shape
    H = w_hh_ref.shape[0]

    w_hh = w_hh_ref[...]                                   # (H, H)
    # Hoist broadcasts out of the recurrence (JAX does not CSE broadcast_in_dim).
    w_ih_b = jnp.broadcast_to(w_ih_ref[...], (H, Bp))      # (H, Bp)
    b_b = jnp.broadcast_to(b_ref[...], (H, Bp))            # (H, Bp)

    h = h0_ref[...]                                        # (H, Bp)

    # Fully unrolled recurrence: static, 128-aligned slices; exactly one MXU
    # matmul per step; the input term runs on the VPU (different VLIW slot).
    for t in range(T):
        x_t = x_ref[pl.ds(t, 1), :]                        # (1, Bp)
        pre = (w_ih_b * x_t
               + jnp.dot(w_hh, h, preferred_element_type=jnp.float32)
               + b_b)                                      # (H, Bp)
        h = jnp.tanh(pre)                                  # (H, Bp)  (EUP)
        hs_ref[:, pl.ds(t * Bp, Bp)] = h                   # lane-aligned store

    h_n_ref[...] = h

    # Output projection hoisted off the serial chain: one well-shaped MXU
    # matmul + one lane-dense store for all T steps at once.
    hs = hs_ref[...]                                       # (H, T*Bp)
    o = jnp.dot(w_out_ref[...], hs,
                preferred_element_type=jnp.float32)        # (1, T*Bp)
    outs_ref[...] = o + b_out_ref[...]                     # (1,1) lane-broadcast


@jax.jit
def rnn_forward(x, h_state, params):
    """x: (B, T, 1) f32, h_state: (1, B, 32) f32 -> ((B, T, 1), (1, B, 32))."""
    B, T, _ = x.shape
    w_ih, w_hh, b_ih, b_hh, w_out, b_out = params

    pad = ((0, 0), (0, B_PAD - B))
    x_tb = jnp.pad(jnp.transpose(x[..., 0], (1, 0)), pad)        # (T, Bp)
    h0 = jnp.pad(jnp.transpose(h_state[0], (1, 0)), pad)         # (H, Bp)
    b = (b_ih + b_hh).reshape(HIDDEN, 1)                         # (H, 1)
    b_out2 = b_out.reshape(1, 1)                                 # (1, 1)

    vmem = pl.BlockSpec(memory_space=pltpu.MemorySpace.VMEM)
    outs_flat, h_n = pl.pallas_call(
        rnn_kernel,
        out_shape=(
            jax.ShapeDtypeStruct((1, T * B_PAD), jnp.float32),
            jax.ShapeDtypeStruct((HIDDEN, B_PAD), jnp.float32),
        ),
        in_specs=[vmem] * 7,
        out_specs=(vmem, vmem),
        scratch_shapes=[pltpu.VMEM((HIDDEN, T * B_PAD), jnp.float32)],
    )(x_tb, w_ih, w_hh, b, h0, w_out, b_out2)

    # Unpad lanes and restore torch layouts.
    outs = jnp.transpose(outs_flat.reshape(T, B_PAD)[:, :B], (1, 0))
    outs = outs.reshape(B, T, 1)
    h_state_out = jnp.transpose(h_n[:, :B], (1, 0))[None, :, :]  # (1, B, H)
    return outs, h_state_out


def reference_forward(x, h_state, params):
    """Pure-JAX reference matching torch.nn.RNN + Linear semantics."""
    w_ih, w_hh, b_ih, b_hh, w_out, b_out = params
    B, T, _ = x.shape

    def step(h, x_t):
        # h: (B, H), x_t: (B, 1)
        h_new = jnp.tanh(x_t @ w_ih.T + b_ih + h @ w_hh.T + b_hh)
        return h_new, h_new

    h0 = h_state[0]                                    # (B, H)
    h_n, r_out = lax.scan(step, h0, jnp.transpose(x, (1, 0, 2)))
    r_out = jnp.transpose(r_out, (1, 0, 2))            # (B, T, H)
    outs = r_out.reshape(-1, HIDDEN) @ w_out.T + b_out
    return outs.reshape(B, T, 1), h_n[None]


def init_params(key):
    """Deterministic params, PyTorch-style uniform(-1/sqrt(H), 1/sqrt(H))."""
    k = 1.0 / jnp.sqrt(jnp.float32(HIDDEN))
    keys = jax.random.split(key, 6)
    w_ih = jax.random.uniform(keys[0], (HIDDEN, INPUT_SIZE), jnp.float32, -k, k)
    w_hh = jax.random.uniform(keys[1], (HIDDEN, HIDDEN), jnp.float32, -k, k)
    b_ih = jax.random.uniform(keys[2], (HIDDEN,), jnp.float32, -k, k)
    b_hh = jax.random.uniform(keys[3], (HIDDEN,), jnp.float32, -k, k)
    w_out = jax.random.uniform(keys[4], (1, HIDDEN), jnp.float32, -k, k)
    b_out = jax.random.uniform(keys[5], (1,), jnp.float32, -k, k)
    return w_ih, w_hh, b_ih, b_hh, w_out, b_out


if __name__ == "__main__":
    key = jax.random.PRNGKey(0)
    k_x, k_h, k_p = jax.random.split(key, 3)

    B = 2
    x = jax.random.normal(k_x, (B, TIME_STEP, INPUT_SIZE), jnp.float32)
    h_state = jax.random.normal(k_h, (1, B, HIDDEN), jnp.float32)
    params = init_params(k_p)

    outs, h_n = jax.block_until_ready(rnn_forward(x, h_state, params))

    ref_outs, ref_h_n = reference_forward(x, h_state, params)
    assert outs.shape == (B, TIME_STEP, 1), outs.shape
    assert h_n.shape == (1, B, HIDDEN), h_n.shape
    assert jnp.allclose(outs, ref_outs, atol=1e-5, rtol=1e-5)
    assert jnp.allclose(h_n, ref_h_n, atol=1e-5, rtol=1e-5)

    print("KERNEL_OK")
</pallas_src>

<mosaic_0001>
module attributes {stable_mosaic.version = 11 : i64} {
  func.func @rnn_kernel(%arg0: memref<10x128xf32, #tpu.memory_space<vmem>>, %arg1: memref<32x1xf32, #tpu.memory_space<vmem>>, %arg2: memref<32x32xf32, #tpu.memory_space<vmem>>, %arg3: memref<32x1xf32, #tpu.memory_space<vmem>>, %arg4: memref<32x128xf32, #tpu.memory_space<vmem>>, %arg5: memref<1x32xf32, #tpu.memory_space<vmem>>, %arg6: memref<1x1xf32, #tpu.memory_space<vmem>>, %arg7: memref<1x1280xf32, #tpu.memory_space<vmem>>, %arg8: memref<32x128xf32, #tpu.memory_space<vmem>>, %arg9: memref<32x1280xf32, #tpu.memory_space<vmem>>) attributes {dimension_semantics = [], scalar_prefetch = 0 : i64, scratch_operands = 1 : i64, tpu.core_type = #tpu.core_type<tc>} {
    %c0 = arith.constant 0 : index
    %c0_0 = arith.constant 0 : index
    %0 = vector.load %arg2[%c0, %c0_0] : memref<32x32xf32, #tpu.memory_space<vmem>>, vector<32x32xf32>
    %c0_1 = arith.constant 0 : index
    %c0_2 = arith.constant 0 : index
    %1 = vector.load %arg1[%c0_1, %c0_2] : memref<32x1xf32, #tpu.memory_space<vmem>>, vector<32x1xf32>
    %2 = vector.shape_cast %1 : vector<32x1xf32> to vector<32x1xf32>
    %3 = vector.broadcast %2 : vector<32x1xf32> to vector<32x128xf32>
    %c0_3 = arith.constant 0 : index
    %c0_4 = arith.constant 0 : index
    %4 = vector.load %arg3[%c0_3, %c0_4] : memref<32x1xf32, #tpu.memory_space<vmem>>, vector<32x1xf32>
    %5 = vector.shape_cast %4 : vector<32x1xf32> to vector<32x1xf32>
    %6 = vector.broadcast %5 : vector<32x1xf32> to vector<32x128xf32>
    %c0_5 = arith.constant 0 : index
    %c0_6 = arith.constant 0 : index
    %7 = vector.load %arg4[%c0_5, %c0_6] : memref<32x128xf32, #tpu.memory_space<vmem>>, vector<32x128xf32>
    %c0_7 = arith.constant 0 : index
    %c0_8 = arith.constant 0 : index
    %8 = vector.load %arg0[%c0_7, %c0_8] : memref<10x128xf32, #tpu.memory_space<vmem>>, vector<1x128xf32>
    %9 = vector.broadcast %8 : vector<1x128xf32> to vector<32x128xf32>
    %10 = arith.mulf %3, %9 : vector<32x128xf32>
    %cst = arith.constant dense<0.000000e+00> : vector<32x128xf32>
    %11 = tpu.matmul %0, %7, %cst {dimension_numbers = #tpu.dot_dimension_numbers<[1], [0], [0], [1], [0, 0, 1, 1], [], []>} : vector<32x32xf32>, vector<32x128xf32>, vector<32x128xf32> -> vector<32x128xf32>
    %12 = arith.addf %10, %11 : vector<32x128xf32>
    %13 = arith.addf %12, %6 : vector<32x128xf32>
    %14 = math.tanh %13 : vector<32x128xf32>
    %c0_9 = arith.constant 0 : index
    %c0_10 = arith.constant 0 : index
    %15 = vector.load %arg9[%c0_9, %c0_10] : memref<32x1280xf32, #tpu.memory_space<vmem>>, vector<32x128xf32>
    tpu.vector_store %arg9[%c0_9, %c0_10], %14 {strides = array<i32>} : memref<32x1280xf32, #tpu.memory_space<vmem>>, vector<32x128xf32>,
    %c1 = arith.constant 1 : index
    %c0_11 = arith.constant 0 : index
    %16 = vector.load %arg0[%c1, %c0_11] : memref<10x128xf32, #tpu.memory_space<vmem>>, vector<1x128xf32>
    %17 = vector.broadcast %16 : vector<1x128xf32> to vector<32x128xf32>
    %18 = arith.mulf %3, %17 : vector<32x128xf32>
    %cst_12 = arith.constant dense<0.000000e+00> : vector<32x128xf32>
    %19 = tpu.matmul %0, %14, %cst_12 {dimension_numbers = #tpu.dot_dimension_numbers<[1], [0], [0], [1], [0, 0, 1, 1], [], []>} : vector<32x32xf32>, vector<32x128xf32>, vector<32x128xf32> -> vector<32x128xf32>
    %20 = arith.addf %18, %19 : vector<32x128xf32>
    %21 = arith.addf %20, %6 : vector<32x128xf32>
    %22 = math.tanh %21 : vector<32x128xf32>
    %c0_13 = arith.constant 0 : index
    %c128 = arith.constant 128 : index
    %23 = vector.load %arg9[%c0_13, %c128] : memref<32x1280xf32, #tpu.memory_space<vmem>>, vector<32x128xf32>
    tpu.vector_store %arg9[%c0_13, %c128], %22 {strides = array<i32>} : memref<32x1280xf32, #tpu.memory_space<vmem>>, vector<32x128xf32>,
    %c2 = arith.constant 2 : index
    %c0_14 = arith.constant 0 : index
    %24 = vector.load %arg0[%c2, %c0_14] : memref<10x128xf32, #tpu.memory_space<vmem>>, vector<1x128xf32>
    %25 = vector.broadcast %24 : vector<1x128xf32> to vector<32x128xf32>
    %26 = arith.mulf %3, %25 : vector<32x128xf32>
    %cst_15 = arith.constant dense<0.000000e+00> : vector<32x128xf32>
    %27 = tpu.matmul %0, %22, %cst_15 {dimension_numbers = #tpu.dot_dimension_numbers<[1], [0], [0], [1], [0, 0, 1, 1], [], []>} : vector<32x32xf32>, vector<32x128xf32>, vector<32x128xf32> -> vector<32x128xf32>
    %28 = arith.addf %26, %27 : vector<32x128xf32>
    %29 = arith.addf %28, %6 : vector<32x128xf32>
    %30 = math.tanh %29 : vector<32x128xf32>
    %c0_16 = arith.constant 0 : index
    %c256 = arith.constant 256 : index
    %31 = vector.load %arg9[%c0_16, %c256] : memref<32x1280xf32, #tpu.memory_space<vmem>>, vector<32x128xf32>
    tpu.vector_store %arg9[%c0_16, %c256], %30 {strides = array<i32>} : memref<32x1280xf32, #tpu.memory_space<vmem>>, vector<32x128xf32>,
    %c3 = arith.constant 3 : index
    %c0_17 = arith.constant 0 : index
    %32 = vector.load %arg0[%c3, %c0_17] : memref<10x128xf32, #tpu.memory_space<vmem>>, vector<1x128xf32>
    %33 = vector.broadcast %32 : vector<1x128xf32> to vector<32x128xf32>
    %34 = arith.mulf %3, %33 : vector<32x128xf32>
    %cst_18 = arith.constant dense<0.000000e+00> : vector<32x128xf32>
    %35 = tpu.matmul %0, %30, %cst_18 {dimension_numbers = #tpu.dot_dimension_numbers<[1], [0], [0], [1], [0, 0, 1, 1], [], []>} : vector<32x32xf32>, vector<32x128xf32>, vector<32x128xf32> -> vector<32x128xf32>
    %36 = arith.addf %34, %35 : vector<32x128xf32>
    %37 = arith.addf %36, %6 : vector<32x128xf32>
    %38 = math.tanh %37 : vector<32x128xf32>
    %c0_19 = arith.constant 0 : index
    %c384 = arith.constant 384 : index
    %39 = vector.load %arg9[%c0_19, %c384] : memref<32x1280xf32, #tpu.memory_space<vmem>>, vector<32x128xf32>
    tpu.vector_store %arg9[%c0_19, %c384], %38 {strides = array<i32>} : memref<32x1280xf32, #tpu.memory_space<vmem>>, vector<32x128xf32>,
    %c4 = arith.constant 4 : index
    %c0_20 = arith.constant 0 : index
    %40 = vector.load %arg0[%c4, %c0_20] : memref<10x128xf32, #tpu.memory_space<vmem>>, vector<1x128xf32>
    %41 = vector.broadcast %40 : vector<1x128xf32> to vector<32x128xf32>
    %42 = arith.mulf %3, %41 : vector<32x128xf32>
    %cst_21 = arith.constant dense<0.000000e+00> : vector<32x128xf32>
    %43 = tpu.matmul %0, %38, %cst_21 {dimension_numbers = #tpu.dot_dimension_numbers<[1], [0], [0], [1], [0, 0, 1, 1], [], []>} : vector<32x32xf32>, vector<32x128xf32>, vector<32x128xf32> -> vector<32x128xf32>
    %44 = arith.addf %42, %43 : vector<32x128xf32>
    %45 = arith.addf %44, %6 : vector<32x128xf32>
    %46 = math.tanh %45 : vector<32x128xf32>
    %c0_22 = arith.constant 0 : index
    %c512 = arith.constant 512 : index
    %47 = vector.load %arg9[%c0_22, %c512] : memref<32x1280xf32, #tpu.memory_space<vmem>>, vector<32x128xf32>
    tpu.vector_store %arg9[%c0_22, %c512], %46 {strides = array<i32>} : memref<32x1280xf32, #tpu.memory_space<vmem>>, vector<32x128xf32>,
    %c5 = arith.constant 5 : index
    %c0_23 = arith.constant 0 : index
    %48 = vector.load %arg0[%c5, %c0_23] : memref<10x128xf32, #tpu.memory_space<vmem>>, vector<1x128xf32>
    %49 = vector.broadcast %48 : vector<1x128xf32> to vector<32x128xf32>
    %50 = arith.mulf %3, %49 : vector<32x128xf32>
    %cst_24 = arith.constant dense<0.000000e+00> : vector<32x128xf32>
    %51 = tpu.matmul %0, %46, %cst_24 {dimension_numbers = #tpu.dot_dimension_numbers<[1], [0], [0], [1], [0, 0, 1, 1], [], []>} : vector<32x32xf32>, vector<32x128xf32>, vector<32x128xf32> -> vector<32x128xf32>
    %52 = arith.addf %50, %51 : vector<32x128xf32>
    %53 = arith.addf %52, %6 : vector<32x128xf32>
    %54 = math.tanh %53 : vector<32x128xf32>
    %c0_25 = arith.constant 0 : index
    %c640 = arith.constant 640 : index
    %55 = vector.load %arg9[%c0_25, %c640] : memref<32x1280xf32, #tpu.memory_space<vmem>>, vector<32x128xf32>
    tpu.vector_store %arg9[%c0_25, %c640], %54 {strides = array<i32>} : memref<32x1280xf32, #tpu.memory_space<vmem>>, vector<32x128xf32>,
    %c6 = arith.constant 6 : index
    %c0_26 = arith.constant 0 : index
    %56 = vector.load %arg0[%c6, %c0_26] : memref<10x128xf32, #tpu.memory_space<vmem>>, vector<1x128xf32>
    %57 = vector.broadcast %56 : vector<1x128xf32> to vector<32x128xf32>
    %58 = arith.mulf %3, %57 : vector<32x128xf32>
    %cst_27 = arith.constant dense<0.000000e+00> : vector<32x128xf32>
    %59 = tpu.matmul %0, %54, %cst_27 {dimension_numbers = #tpu.dot_dimension_numbers<[1], [0], [0], [1], [0, 0, 1, 1], [], []>} : vector<32x32xf32>, vector<32x128xf32>, vector<32x128xf32> -> vector<32x128xf32>
    %60 = arith.addf %58, %59 : vector<32x128xf32>
    %61 = arith.addf %60, %6 : vector<32x128xf32>
    %62 = math.tanh %61 : vector<32x128xf32>
    %c0_28 = arith.constant 0 : index
    %c768 = arith.constant 768 : index
    %63 = vector.load %arg9[%c0_28, %c768] : memref<32x1280xf32, #tpu.memory_space<vmem>>, vector<32x128xf32>
    tpu.vector_store %arg9[%c0_28, %c768], %62 {strides = array<i32>} : memref<32x1280xf32, #tpu.memory_space<vmem>>, vector<32x128xf32>,
    %c7 = arith.constant 7 : index
    %c0_29 = arith.constant 0 : index
    %64 = vector.load %arg0[%c7, %c0_29] : memref<10x128xf32, #tpu.memory_space<vmem>>, vector<1x128xf32>
    %65 = vector.broadcast %64 : vector<1x128xf32> to vector<32x128xf32>
    %66 = arith.mulf %3, %65 : vector<32x128xf32>
    %cst_30 = arith.constant dense<0.000000e+00> : vector<32x128xf32>
    %67 = tpu.matmul %0, %62, %cst_30 {dimension_numbers = #tpu.dot_dimension_numbers<[1], [0], [0], [1], [0, 0, 1, 1], [], []>} : vector<32x32xf32>, vector<32x128xf32>, vector<32x128xf32> -> vector<32x128xf32>
    %68 = arith.addf %66, %67 : vector<32x128xf32>
    %69 = arith.addf %68, %6 : vector<32x128xf32>
    %70 = math.tanh %69 : vector<32x128xf32>
    %c0_31 = arith.constant 0 : index
    %c896 = arith.constant 896 : index
    %71 = vector.load %arg9[%c0_31, %c896] : memref<32x1280xf32, #tpu.memory_space<vmem>>, vector<32x128xf32>
    tpu.vector_store %arg9[%c0_31, %c896], %70 {strides = array<i32>} : memref<32x1280xf32, #tpu.memory_space<vmem>>, vector<32x128xf32>,
    %c8 = arith.constant 8 : index
    %c0_32 = arith.constant 0 : index
    %72 = vector.load %arg0[%c8, %c0_32] : memref<10x128xf32, #tpu.memory_space<vmem>>, vector<1x128xf32>
    %73 = vector.broadcast %72 : vector<1x128xf32> to vector<32x128xf32>
    %74 = arith.mulf %3, %73 : vector<32x128xf32>
    %cst_33 = arith.constant dense<0.000000e+00> : vector<32x128xf32>
    %75 = tpu.matmul %0, %70, %cst_33 {dimension_numbers = #tpu.dot_dimension_numbers<[1], [0], [0], [1], [0, 0, 1, 1], [], []>} : vector<32x32xf32>, vector<32x128xf32>, vector<32x128xf32> -> vector<32x128xf32>
    %76 = arith.addf %74, %75 : vector<32x128xf32>
    %77 = arith.addf %76, %6 : vector<32x128xf32>
    %78 = math.tanh %77 : vector<32x128xf32>
    %c0_34 = arith.constant 0 : index
    %c1024 = arith.constant 1024 : index
    %79 = vector.load %arg9[%c0_34, %c1024] : memref<32x1280xf32, #tpu.memory_space<vmem>>, vector<32x128xf32>
    tpu.vector_store %arg9[%c0_34, %c1024], %78 {strides = array<i32>} : memref<32x1280xf32, #tpu.memory_space<vmem>>, vector<32x128xf32>,
    %c9 = arith.constant 9 : index
    %c0_35 = arith.constant 0 : index
    %80 = vector.load %arg0[%c9, %c0_35] : memref<10x128xf32, #tpu.memory_space<vmem>>, vector<1x128xf32>
    %81 = vector.broadcast %80 : vector<1x128xf32> to vector<32x128xf32>
    %82 = arith.mulf %3, %81 : vector<32x128xf32>
    %cst_36 = arith.constant dense<0.000000e+00> : vector<32x128xf32>
    %83 = tpu.matmul %0, %78, %cst_36 {dimension_numbers = #tpu.dot_dimension_numbers<[1], [0], [0], [1], [0, 0, 1, 1], [], []>} : vector<32x32xf32>, vector<32x128xf32>, vector<32x128xf32> -> vector<32x128xf32>
    %84 = arith.addf %82, %83 : vector<32x128xf32>
    %85 = arith.addf %84, %6 : vector<32x128xf32>
    %86 = math.tanh %85 : vector<32x128xf32>
    %c0_37 = arith.constant 0 : index
    %c1152 = arith.constant 1152 : index
    %87 = vector.load %arg9[%c0_37, %c1152] : memref<32x1280xf32, #tpu.memory_space<vmem>>, vector<32x128xf32>
    tpu.vector_store %arg9[%c0_37, %c1152], %86 {strides = array<i32>} : memref<32x1280xf32, #tpu.memory_space<vmem>>, vector<32x128xf32>,
    %c0_38 = arith.constant 0 : index
    %c0_39 = arith.constant 0 : index
    %88 = vector.load %arg8[%c0_38, %c0_39] : memref<32x128xf32, #tpu.memory_space<vmem>>, vector<32x128xf32>
    tpu.vector_store %arg8[%c0_38, %c0_39], %86 {strides = array<i32>} : memref<32x128xf32, #tpu.memory_space<vmem>>, vector<32x128xf32>,
    %c0_40 = arith.constant 0 : index
    %c0_41 = arith.constant 0 : index
    %89 = vector.load %arg9[%c0_40, %c0_41] : memref<32x1280xf32, #tpu.memory_space<vmem>>, vector<32x1280xf32>
    %c0_42 = arith.constant 0 : index
    %c0_43 = arith.constant 0 : index
    %90 = vector.load %arg5[%c0_42, %c0_43] : memref<1x32xf32, #tpu.memory_space<vmem>>, vector<1x32xf32>
    %cst_44 = arith.constant dense<0.000000e+00> : vector<1x1280xf32>
    %91 = tpu.matmul %90, %89, %cst_44 {dimension_numbers = #tpu.dot_dimension_numbers<[1], [0], [0], [1], [0, 0, 1, 1], [], []>} : vector<1x32xf32>, vector<32x1280xf32>, vector<1x1280xf32> -> vector<1x1280xf32>
    %c0_45 = arith.constant 0 : index
    %c0_46 = arith.constant 0 : index
    %92 = vector.load %arg6[%c0_45, %c0_46] : memref<1x1xf32, #tpu.memory_space<vmem>>, vector<1x1xf32>
    %93 = vector.broadcast %92 : vector<1x1xf32> to vector<1x1280xf32>
    %94 = arith.addf %91, %93 : vector<1x1280xf32>
    %c0_47 = arith.constant 0 : index
    %c0_48 = arith.constant 0 : index
    %95 = vector.load %arg7[%c0_47, %c0_48] : memref<1x1280xf32, #tpu.memory_space<vmem>>, vector<1x1280xf32>
    tpu.vector_store %arg7[%c0_47, %c0_48], %94 {strides = array<i32>} : memref<1x1280xf32, #tpu.memory_space<vmem>>, vector<1x1280xf32>,
    return
  }
}

</mosaic_0001>

<bundles_post_ra>
// kernel: rnn_forward.1
= control target key start
LH: loop header
LB: loop body
LE: loop exit
PB: predicated region body
PF: predicated region fallthrough
CT: control target
= control target key end

     0   :  { %vm95_vm0 = vcmask 261120   ;;  %v2062_v2 = vmov 0   ;;  %s2647_s4 = inlined_call_operand.vmem [shape: f32[32,128], index: 4, kind: input, shape index: {}]   ;;  %s2648_s2 = inlined_call_operand.vmem [shape: f32[32,32], index: 2, kind: input, shape index: {}]   ;;  %s2649_s1 = inlined_call_operand.vmem [shape: f32[32,1], index: 1, kind: input, shape index: {}]   ;;  %s2650_s6 = inlined_call_operand.<no memory space> [shape: f32[1,1], index: 6, kind: input, shape index: {}]   ;;  %s2651_s3 = inlined_call_operand.vmem [shape: f32[32,1], index: 3, kind: input, shape index: {}]   ;;  %s2652_s0 = inlined_call_operand.vmem [shape: f32[10,128], index: 0, kind: input, shape index: {}]   ;;  %s2653_s5 = inlined_call_operand.vmem [shape: f32[1,32], index: 5, kind: input, shape index: {}]   ;;  %s2654_s8 = inlined_call_operand.vmem [shape: f32[32,128], index: 8, kind: output, shape index: {1}]   ;;  %s2655_s7 = inlined_call_operand.vmem [shape: f32[1,1280], index: 7, kind: output, shape index: {0}]  }
   0x1   :  { %v85_v0 = vld [vmem:[%s2647_s4 + $0x18] sm:$0xff]  ;;  %v84_v1 = vld [vmem:[%s2647_s4 + $0x10] sm:$0xff]  ;;  %1980 = vset.pattern.permute.xlu0 %v2062_v2  ;;  %1981 = vset.pattern.permute.xlu1 %v2062_v2  ;;  %v14_v3 = vstv %s2650_s6  ;;  %v2122_v4 = vld [vmem:[%s2648_s2] sm:$0xff] }
   0x2   :  { %1837 = vmatprep.subr.mxu0 %v85_v0  ;;  %15 = vst [vmem:[#allocation3] sm:$0x1] %v14_v3  ;;  %v83_v5 = vld [vmem:[%s2647_s4 + $0x8] sm:$0xff]  ;;  %1845 = vmatprep.mubr.msk.f32.mxu0 %vm95_vm0, %v2122_v4  ;;  %v37_v6 = vld [vmem:[%s2649_s1 + $0x18] sm:$0xff]  ;;  %v82_v8 = vld [vmem:[%s2647_s4] sm:$0xff] }
   0x3   :  { %1838 = vmatpush3.msra.mxu0 %v85_v0  ;;  %55 = vperm.xlu0 %1980, %v37_v6   ;;  %v35_v7 = vld [vmem:[%s2649_s1 + $0x8] sm:$0xff]  ;;  %v36_v9 = vld [vmem:[%s2649_s1 + $0x10] sm:$0xff]  ;;  %v61_v10 = vld [vmem:[%s2651_s3 + $0x18] sm:$0xff] }
   0x4   :  { %1839 = vmatprep.subr.mxu0 %v84_v1  ;;  %45 = vperm.xlu1 %1981, %v35_v7   ;;  %v2149_v11 = vld [vmem:[%s2648_s2 + $0x8] sm:$0xff]  ;;  %v2154_v12 = vld [vmem:[%s2648_s2 + $0x10] sm:$0xff]  ;;  %v34_v13 = vld [vmem:[%s2649_s1] sm:$0xff] }
   0x5   :  { %1840 = vmatpush3.msra.mxu0 %v84_v1  ;;  %1859 = vmatprep.mubr.msk.f32.mxu1 %vm95_vm0, %v2122_v4  ;;  %v60_v14 = vld [vmem:[%s2651_s3 + $0x10] sm:$0xff]  ;;  %v2169_v15 = vld [vmem:[%s2648_s2 + $0x18] sm:$0xff]  ;;  %v59_v16 = vld [vmem:[%s2651_s3 + $0x8] sm:$0xff] }
   0x6   :  { %1841 = vmatprep.subr.mxu0 %v83_v5  ;;  %v58_v17 = vld [vmem:[%s2651_s3] sm:$0xff]  ;;  %v1742_v43 = vld [vmem:[%s2652_s0 + $0x8] ss:$0 sm:$0xff]  ;;  %v1747_v47 = vld [vmem:[%s2652_s0 + $0x9] ss:$0 sm:$0xff] }
   0x7   :  { %1842 = vmatpush3.msra.mxu0 %v83_v5  ;;  %50 = vperm.xlu0 %1980, %v36_v9   ;;  %v1707_v19 = vld [vmem:[%s2652_s0 + $0x1] ss:$0 sm:$0xff]  ;;  %v1712_v20 = vld [vmem:[%s2652_s0 + $0x2] ss:$0 sm:$0xff]  ;;  %v1717_v21 = vld [vmem:[%s2652_s0 + $0x3] ss:$0 sm:$0xff] }
   0x8   :  { %1843 = vmatprep.subr.mxu0 %v82_v8  ;;  %79 = vperm.xlu1 %1981, %v61_v10   ;;  %v1722_v23 = vld [vmem:[%s2652_s0 + $0x4] ss:$0 sm:$0xff]  ;;  %v1727_v24 = vld [vmem:[%s2652_s0 + $0x5] ss:$0 sm:$0xff]  ;;  %v1732_v29 = vld [vmem:[%s2652_s0 + $0x6] ss:$0 sm:$0xff] }
   0x9   :  { %1844 = vmatpush3.msra.mxu0 %v82_v8  ;;  %v1244_v18 = vld [vmem:[#allocation3] sm:$0x1]  ;;  %v1737_v30 = vld [vmem:[%s2652_s0 + $0x7] ss:$0 sm:$0xff] }
   0xa   :  { %1846 = vmatmul.mubr.msk.f32.vlgmr.msra.gmra.mxu0 %vm95_vm0, %v2149_v11  ;;  %v1702_v6 = vld [vmem:[%s2652_s0] ss:$0 sm:$0xff] }
   0xb   :  { %1848 = vmatprep.mubr.msk.f32.mxu0 %vm95_vm0, %v2154_v12  ;;  %40 = vperm.xlu0 %1980, %v34_v13  }
   0xc   :  { %74 = vperm.xlu1 %1981, %v60_v14  }
   0xe   :  { %1849 = vmatmul.mubr.msk.f32.gmra.mxu0 %vm95_vm0, %v2169_v15 }
   0xf   :  { %1873 = vmatprep.mubr.msk.f32.mxu0 %vm95_vm0, %v2122_v4  ;;  %69 = vperm.xlu0 %1980, %v59_v16  }
  0x10   :  { %64 = vperm.xlu1 %1981, %v58_v17  }
  0x13   :  { %1247 = vperm.xlu0 %1980, %v1244_v18  }
  0x7e   :  { %v56_v22 = vpop.permute.xlu0 %55 }
  0x7f   :  { %v46_v25 = vpop.permute.xlu1 %45  ;;  %v2196_v26 = vmul.f32 %v1707_v19, %v56_v22  ;;  %v2198_v27 = vmul.f32 %v1712_v20, %v56_v22  ;;  %v2200_v28 = vmul.f32 %v1717_v21, %v56_v22  ;;  %v2216_v35 = vmul.f32 %v1722_v23, %v56_v22 }
  0x80   :  { %v2208_v31 = vmul.f32 %v1707_v19, %v46_v25  ;;  %v2210_v32 = vmul.f32 %v1712_v20, %v46_v25  ;;  %v2212_v33 = vmul.f32 %v1717_v21, %v46_v25  ;;  %v2214_v34 = vmul.f32 %v1722_v23, %v46_v25 }
  0x81   :  { %v2218_v36 = vmul.f32 %v1727_v24, %v46_v25  ;;  %v2220_v37 = vmul.f32 %v1727_v24, %v56_v22  ;;  %v2222_v39 = vmul.f32 %v1732_v29, %v46_v25  ;;  %v2224_v40 = vmul.f32 %v1732_v29, %v56_v22 }
  0x82   :  { %v51_v38 = vpop.permute.xlu0 %50  ;;  %v2226_v41 = vmul.f32 %v1737_v30, %v46_v25  ;;  %v2228_v42 = vmul.f32 %v1737_v30, %v56_v22  ;;  %v2250_v52 = vmul.f32 %v1742_v43, %v46_v25  ;;  %v2252_v53 = vmul.f32 %v1742_v43, %v56_v22 }
  0x83   :  { %v2233_v44 = vmul.f32 %v1707_v19, %v51_v38  ;;  %v2235_v45 = vmul.f32 %v1712_v20, %v51_v38  ;;  %v2237_v46 = vmul.f32 %v1717_v21, %v51_v38  ;;  %v2242_v48 = vmul.f32 %v1722_v23, %v51_v38  ;;  %v2278_v5 = vpop.permute.xlu1 %79 }
  0x84   :  { %v2244_v49 = vmul.f32 %v1727_v24, %v51_v38  ;;  %v2246_v50 = vmul.f32 %v1732_v29, %v51_v38  ;;  %v2248_v51 = vmul.f32 %v1737_v30, %v51_v38  ;;  %v2254_v54 = vmul.f32 %v1742_v43, %v51_v38 }
  0x85   :  { %v2256_v55 = vmul.f32 %v1747_v47, %v46_v25  ;;  %v2258_v57 = vmul.f32 %v1747_v47, %v56_v22  ;;  %v2260_v58 = vmul.f32 %v1747_v47, %v51_v38  ;;  %v92_v8 = vmul.f32 %v1702_v6, %v46_v25 }
  0x86   :  { %v41_v56 = vpop.permute.xlu0 %40  ;;  %v94_v10 = vmul.f32 %v1702_v6, %v56_v22 }
  0x87   :  { %v214_v59 = vmul.f32 %v1707_v19, %v41_v56  ;;  %v2262_v60 = vmul.f32 %v1712_v20, %v41_v56  ;;  %v2264_v61 = vmul.f32 %v1717_v21, %v41_v56  ;;  %v2266_v62 = vmul.f32 %v1722_v23, %v41_v56  ;;  %v2283_v13 = vpop.permute.xlu1 %74 }
  0x88   :  { %v2268_v63 = vmul.f32 %v1727_v24, %v41_v56  ;;  %v2270_v0 = vmul.f32 %v1732_v29, %v41_v56  ;;  %v2272_v1 = vmul.f32 %v1737_v30, %v41_v56  ;;  %v2274_v2 = vmul.f32 %v1742_v43, %v41_v56 }
  0x89   :  { %v2276_v3 = vmul.f32 %v1747_v47, %v41_v56  ;;  %v91_v17 = vmul.f32 %v1702_v6, %v41_v56  ;;  %v93_v19 = vmul.f32 %v1702_v6, %v51_v38 }
  0x8a   :  { %v2286_v29 = vpop.permute.xlu0 %69 }
  0x8b   :  { %v2290_v22 = vpop.permute.xlu1 %64 }
  0xca   :  { %v1847_v7 = vpop.f32.mrf.mxu0 }
  0xcb   :  { %v194_v16 = vadd.f32 %v1847_v7, %v92_v8 }
  0xcc   :  { %v174_v9 = vpop.f32.mrf.mxu0 }
  0xcd   :  { %v193_v21 = vadd.f32 %v174_v9, %v91_v17  ;;  %v198_v30 = vadd.f32 %v194_v16, %v2286_v29 }
  0xce   :  { %v1850_v14 = vpop.f32.mrf.mxu0 }
  0xcf   :  { %v196_v18 = vadd.f32 %v1850_v14, %v94_v10  ;;  %v197_v43 = vadd.f32 %v193_v21, %v2290_v22 }
  0xd0   :  { %v184_v20 = vpop.f32.mrf.mxu0 }
  0xd1   :  { %v200_v23 = vadd.f32 %v196_v18, %v2278_v5  ;;  %v195_v24 = vadd.f32 %v184_v20, %v93_v19 }
  0xd3   :  { %1982 = vtanh.f32 %v200_v23  ;;  %v199_v25 = vadd.f32 %v195_v24, %v2283_v13 }
  0xd5   :  { %1984 = vtanh.f32 %v199_v25 }
  0xd6   :  { %1986 = vtanh.f32 %v198_v30 }
  0xd7   :  { %1988 = vtanh.f32 %v197_v43 }
  0xe0   :  { %v2293_v38 = vpop.eup %1982 }
  0xe1   :  { %1851 = vmatprep.subr.mxu1 %v2293_v38 }
  0xe2   :  { %v2296_v47 = vpop.eup %1984  ;;  %1852 = vmatpush3.msra.mxu1 %v2293_v38 }
  0xe3   :  { %1853 = vmatprep.subr.mxu1 %v2296_v47  ;;  %v2300_v56 = vpop.eup %1986 }
  0xe4   :  { %1854 = vmatpush3.msra.mxu1 %v2296_v47  ;;  %v2304_v6 = vpop.eup %1988 }
  0xe5   :  { %1855 = vmatprep.subr.mxu1 %v2300_v56 }
  0xe6   :  { %1856 = vmatpush3.msra.mxu1 %v2300_v56 }
  0xe7   :  { %1857 = vmatprep.subr.mxu1 %v2304_v6 }
  0xe8   :  { %1858 = vmatpush3.msra.mxu1 %v2304_v6 }
  0xe9   :  { %1860 = vmatmul.mubr.msk.f32.vlgmr.msra.gmra.mxu1 %vm95_vm0, %v2149_v11 }
  0xea   :  { %1862 = vmatprep.mubr.msk.f32.mxu1 %vm95_vm0, %v2154_v12 }
  0xed   :  { %1863 = vmatmul.mubr.msk.f32.gmra.mxu1 %vm95_vm0, %v2169_v15 }
  0xee   :  { %1887 = vmatprep.mubr.msk.f32.mxu1 %vm95_vm0, %v2122_v4 }
 0x1a9   :  { %v1861_v7 = vpop.f32.mrf.mxu1 }
 0x1aa   :  { %v304_v10 = vadd.f32 %v1861_v7, %v2208_v31 }
 0x1ab   :  { %v284_v8 = vpop.f32.mrf.mxu1 }
 0x1ac   :  { %v303_v17 = vadd.f32 %v284_v8, %v214_v59  ;;  %v308_v20 = vadd.f32 %v304_v10, %v2286_v29 }
 0x1ad   :  { %v1864_v9 = vpop.f32.mrf.mxu1 }
 0x1ae   :  { %v306_v14 = vadd.f32 %v1864_v9, %v2196_v26  ;;  %v307_v23 = vadd.f32 %v303_v17, %v2290_v22 }
 0x1af   :  { %v294_v16 = vpop.f32.mrf.mxu1 }
 0x1b0   :  { %v310_v18 = vadd.f32 %v306_v14, %v2278_v5  ;;  %v305_v19 = vadd.f32 %v294_v16, %v2233_v44 }
 0x1b2   :  { %1990 = vtanh.f32 %v310_v18  ;;  %v309_v21 = vadd.f32 %v305_v19, %v2283_v13 }
 0x1b4   :  { %1992 = vtanh.f32 %v309_v21 }
 0x1b5   :  { %1994 = vtanh.f32 %v308_v20 }
 0x1b6   :  { %1996 = vtanh.f32 %v307_v23 }
 0x1bf   :  { %v2324_v24 = vpop.eup %1990 }
 0x1c0   :  { %1865 = vmatprep.subr.mxu0 %v2324_v24 }
 0x1c1   :  { %v2327_v26 = vpop.eup %1992  ;;  %1866 = vmatpush3.msra.mxu0 %v2324_v24 }
 0x1c2   :  { %1867 = vmatprep.subr.mxu0 %v2327_v26  ;;  %v2331_v31 = vpop.eup %1994 }
 0x1c3   :  { %1868 = vmatpush3.msra.mxu0 %v2327_v26  ;;  %v2335_v44 = vpop.eup %1996 }
 0x1c4   :  { %1869 = vmatprep.subr.mxu0 %v2331_v31 }
 0x1c5   :  { %1870 = vmatpush3.msra.mxu0 %v2331_v31 }
 0x1c6   :  { %1871 = vmatprep.subr.mxu0 %v2335_v44 }
 0x1c7   :  { %1872 = vmatpush3.msra.mxu0 %v2335_v44 }
 0x1c8   :  { %1874 = vmatmul.mubr.msk.f32.vlgmr.msra.gmra.mxu0 %vm95_vm0, %v2149_v11 }
 0x1c9   :  { %1876 = vmatprep.mubr.msk.f32.mxu0 %vm95_vm0, %v2154_v12 }
 0x1cc   :  { %1877 = vmatmul.mubr.msk.f32.gmra.mxu0 %vm95_vm0, %v2169_v15 }
 0x1cd   :  { %1901 = vmatprep.mubr.msk.f32.mxu0 %vm95_vm0, %v2122_v4 }
 0x288   :  { %v1875_v59 = vpop.f32.mrf.mxu0 }
 0x289   :  { %v414_v43 = vadd.f32 %v1875_v59, %v2210_v32 }
 0x28a   :  { %v394_v30 = vpop.f32.mrf.mxu0 }
 0x28b   :  { %v413_v9 = vadd.f32 %v394_v30, %v2262_v60  ;;  %v418_v16 = vadd.f32 %v414_v43, %v2286_v29 }
 0x28c   :  { %v1878_v25 = vpop.f32.mrf.mxu0 }
 0x28d   :  { %v416_v7 = vadd.f32 %v1878_v25, %v2198_v27  ;;  %v417_v18 = vadd.f32 %v413_v9, %v2290_v22 }
 0x28e   :  { %v404_v8 = vpop.f32.mrf.mxu0 }
 0x28f   :  { %v420_v10 = vadd.f32 %v416_v7, %v2278_v5  ;;  %v415_v14 = vadd.f32 %v404_v8, %v2235_v45 }
 0x291   :  { %1998 = vtanh.f32 %v420_v10  ;;  %v419_v17 = vadd.f32 %v415_v14, %v2283_v13 }
 0x293   :  { %2000 = vtanh.f32 %v419_v17 }
 0x294   :  { %2002 = vtanh.f32 %v418_v16 }
 0x295   :  { %2004 = vtanh.f32 %v417_v18 }
 0x29e   :  { %v2356_v32 = vpop.eup %1998 }
 0x29f   :  { %1879 = vmatprep.subr.mxu1 %v2356_v32 }
 0x2a0   :  { %v2359_v27 = vpop.eup %2000  ;;  %1880 = vmatpush3.msra.mxu1 %v2356_v32 }
 0x2a1   :  { %1881 = vmatprep.subr.mxu1 %v2359_v27  ;;  %v2363_v45 = vpop.eup %2002 }
 0x2a2   :  { %1882 = vmatpush3.msra.mxu1 %v2359_v27  ;;  %v2367_v60 = vpop.eup %2004 }
 0x2a3   :  { %1883 = vmatprep.subr.mxu1 %v2363_v45 }
 0x2a4   :  { %1884 = vmatpush3.msra.mxu1 %v2363_v45 }
 0x2a5   :  { %1885 = vmatprep.subr.mxu1 %v2367_v60 }
 0x2a6   :  { %1886 = vmatpush3.msra.mxu1 %v2367_v60 }
 0x2a7   :  { %1888 = vmatmul.mubr.msk.f32.vlgmr.msra.gmra.mxu1 %vm95_vm0, %v2149_v11 }
 0x2a8   :  { %1890 = vmatprep.mubr.msk.f32.mxu1 %vm95_vm0, %v2154_v12 }
 0x2ab   :  { %1891 = vmatmul.mubr.msk.f32.gmra.mxu1 %vm95_vm0, %v2169_v15 }
 0x2ac   :  { %1915 = vmatprep.mubr.msk.f32.mxu1 %vm95_vm0, %v2122_v4 }
 0x367   :  { %v1889_v19 = vpop.f32.mrf.mxu1 }
 0x368   :  { %v524_v23 = vadd.f32 %v1889_v19, %v2212_v33 }
 0x369   :  { %v504_v20 = vpop.f32.mrf.mxu1 }
 0x36a   :  { %v523_v25 = vadd.f32 %v504_v20, %v2264_v61  ;;  %v528_v8 = vadd.f32 %v524_v23, %v2286_v29 }
 0x36b   :  { %v1892_v21 = vpop.f32.mrf.mxu1 }
 0x36c   :  { %v526_v59 = vadd.f32 %v1892_v21, %v2200_v28  ;;  %v527_v10 = vadd.f32 %v523_v25, %v2290_v22 }
 0x36d   :  { %v514_v30 = vpop.f32.mrf.mxu1 }
 0x36e   :  { %v530_v43 = vadd.f32 %v526_v59, %v2278_v5  ;;  %v525_v7 = vadd.f32 %v514_v30, %v2237_v46 }
 0x370   :  { %2006 = vtanh.f32 %v530_v43  ;;  %v529_v9 = vadd.f32 %v525_v7, %v2283_v13 }
 0x372   :  { %2008 = vtanh.f32 %v529_v9 }
 0x373   :  { %2010 = vtanh.f32 %v528_v8 }
 0x374   :  { %2012 = vtanh.f32 %v527_v10 }
 0x37d   :  { %v2388_v33 = vpop.eup %2006 }
 0x37e   :  { %1893 = vmatprep.subr.mxu0 %v2388_v33 }
 0x37f   :  { %v2391_v28 = vpop.eup %2008  ;;  %1894 = vmatpush3.msra.mxu0 %v2388_v33 }
 0x380   :  { %1895 = vmatprep.subr.mxu0 %v2391_v28  ;;  %v2395_v46 = vpop.eup %2010 }
 0x381   :  { %1896 = vmatpush3.msra.mxu0 %v2391_v28  ;;  %v2399_v61 = vpop.eup %2012 }
 0x382   :  { %1897 = vmatprep.subr.mxu0 %v2395_v46 }
 0x383   :  { %1898 = vmatpush3.msra.mxu0 %v2395_v46 }
 0x384   :  { %1899 = vmatprep.subr.mxu0 %v2399_v61 }
 0x385   :  { %1900 = vmatpush3.msra.mxu0 %v2399_v61 }
 0x386   :  { %1902 = vmatmul.mubr.msk.f32.vlgmr.msra.gmra.mxu0 %vm95_vm0, %v2149_v11 }
 0x387   :  { %1904 = vmatprep.mubr.msk.f32.mxu0 %vm95_vm0, %v2154_v12 }
 0x38a   :  { %1905 = vmatmul.mubr.msk.f32.gmra.mxu0 %vm95_vm0, %v2169_v15 }
 0x38b   :  { %1929 = vmatprep.mubr.msk.f32.mxu0 %vm95_vm0, %v2122_v4 }
 0x446   :  { %v1903_v14 = vpop.f32.mrf.mxu0 }
 0x447   :  { %v634_v18 = vadd.f32 %v1903_v14, %v2214_v34 }
 0x448   :  { %v614_v16 = vpop.f32.mrf.mxu0 }
 0x449   :  { %v633_v21 = vadd.f32 %v614_v16, %v2266_v62  ;;  %v638_v30 = vadd.f32 %v634_v18, %v2286_v29 }
 0x44a   :  { %v1906_v17 = vpop.f32.mrf.mxu0 }
 0x44b   :  { %v636_v19 = vadd.f32 %v1906_v17, %v2216_v35  ;;  %v637_v43 = vadd.f32 %v633_v21, %v2290_v22 }
 0x44c   :  { %v624_v20 = vpop.f32.mrf.mxu0 }
 0x44d   :  { %v640_v23 = vadd.f32 %v636_v19, %v2278_v5  ;;  %v635_v59 = vadd.f32 %v624_v20, %v2242_v48 }
 0x44f   :  { %2014 = vtanh.f32 %v640_v23  ;;  %v639_v25 = vadd.f32 %v635_v59, %v2283_v13 }
 0x451   :  { %2016 = vtanh.f32 %v639_v25 }
 0x452   :  { %2018 = vtanh.f32 %v638_v30 }
 0x453   :  { %2020 = vtanh.f32 %v637_v43 }
 0x45c   :  { %v2420_v34 = vpop.eup %2014 }
 0x45d   :  { %1907 = vmatprep.subr.mxu1 %v2420_v34 }
 0x45e   :  { %v2423_v35 = vpop.eup %2016  ;;  %1908 = vmatpush3.msra.mxu1 %v2420_v34 }
 0x45f   :  { %1909 = vmatprep.subr.mxu1 %v2423_v35  ;;  %v2427_v48 = vpop.eup %2018 }
 0x460   :  { %1910 = vmatpush3.msra.mxu1 %v2423_v35  ;;  %v2431_v62 = vpop.eup %2020 }
 0x461   :  { %1911 = vmatprep.subr.mxu1 %v2427_v48 }
 0x462   :  { %1912 = vmatpush3.msra.mxu1 %v2427_v48 }
 0x463   :  { %1913 = vmatprep.subr.mxu1 %v2431_v62 }
 0x464   :  { %1914 = vmatpush3.msra.mxu1 %v2431_v62 }
 0x465   :  { %1916 = vmatmul.mubr.msk.f32.vlgmr.msra.gmra.mxu1 %vm95_vm0, %v2149_v11 }
 0x466   :  { %1918 = vmatprep.mubr.msk.f32.mxu1 %vm95_vm0, %v2154_v12 }
 0x469   :  { %1919 = vmatmul.mubr.msk.f32.gmra.mxu1 %vm95_vm0, %v2169_v15 }
 0x46a   :  { %1943 = vmatprep.mubr.msk.f32.mxu1 %vm95_vm0, %v2122_v4 }
 0x525   :  { %v1917_v7 = vpop.f32.mrf.mxu1 }
 0x526   :  { %v744_v10 = vadd.f32 %v1917_v7, %v2218_v36 }
 0x527   :  { %v724_v8 = vpop.f32.mrf.mxu1 }
 0x528   :  { %v743_v17 = vadd.f32 %v724_v8, %v2268_v63  ;;  %v748_v20 = vadd.f32 %v744_v10, %v2286_v29 }
 0x529   :  { %v1920_v9 = vpop.f32.mrf.mxu1 }
 0x52a   :  { %v746_v14 = vadd.f32 %v1920_v9, %v2220_v37  ;;  %v747_v23 = vadd.f32 %v743_v17, %v2290_v22 }
 0x52b   :  { %v734_v16 = vpop.f32.mrf.mxu1 }
 0x52c   :  { %v750_v18 = vadd.f32 %v746_v14, %v2278_v5  ;;  %v745_v19 = vadd.f32 %v734_v16, %v2244_v49 }
 0x52e   :  { %2022 = vtanh.f32 %v750_v18  ;;  %v749_v21 = vadd.f32 %v745_v19, %v2283_v13 }
 0x530   :  { %2024 = vtanh.f32 %v749_v21 }
 0x531   :  { %2026 = vtanh.f32 %v748_v20 }
 0x532   :  { %2028 = vtanh.f32 %v747_v23 }
 0x53b   :  { %v2452_v36 = vpop.eup %2022 }
 0x53c   :  { %1921 = vmatprep.subr.mxu0 %v2452_v36 }
 0x53d   :  { %v2455_v37 = vpop.eup %2024  ;;  %1922 = vmatpush3.msra.mxu0 %v2452_v36 }
 0x53e   :  { %1923 = vmatprep.subr.mxu0 %v2455_v37  ;;  %v2459_v49 = vpop.eup %2026 }
 0x53f   :  { %1924 = vmatpush3.msra.mxu0 %v2455_v37  ;;  %v2463_v63 = vpop.eup %2028 }
 0x540   :  { %1925 = vmatprep.subr.mxu0 %v2459_v49 }
 0x541   :  { %1926 = vmatpush3.msra.mxu0 %v2459_v49 }
 0x542   :  { %1927 = vmatprep.subr.mxu0 %v2463_v63 }
 0x543   :  { %1928 = vmatpush3.msra.mxu0 %v2463_v63 }
 0x544   :  { %1930 = vmatmul.mubr.msk.f32.vlgmr.msra.gmra.mxu0 %vm95_vm0, %v2149_v11 }
 0x545   :  { %1932 = vmatprep.mubr.msk.f32.mxu0 %vm95_vm0, %v2154_v12 }
 0x548   :  { %1933 = vmatmul.mubr.msk.f32.gmra.mxu0 %vm95_vm0, %v2169_v15 }
 0x549   :  { %1957 = vmatprep.mubr.msk.f32.mxu0 %vm95_vm0, %v2122_v4 }
 0x604   :  { %v1931_v59 = vpop.f32.mrf.mxu0 }
 0x605   :  { %v854_v43 = vadd.f32 %v1931_v59, %v2222_v39 }
 0x606   :  { %v834_v30 = vpop.f32.mrf.mxu0 }
 0x607   :  { %v853_v9 = vadd.f32 %v834_v30, %v2270_v0  ;;  %v858_v16 = vadd.f32 %v854_v43, %v2286_v29 }
 0x608   :  { %v1934_v25 = vpop.f32.mrf.mxu0 }
 0x609   :  { %v856_v7 = vadd.f32 %v1934_v25, %v2224_v40  ;;  %v857_v18 = vadd.f32 %v853_v9, %v2290_v22 }
 0x60a   :  { %v844_v8 = vpop.f32.mrf.mxu0 }
 0x60b   :  { %v860_v10 = vadd.f32 %v856_v7, %v2278_v5  ;;  %v855_v14 = vadd.f32 %v844_v8, %v2246_v50 }
 0x60d   :  { %2030 = vtanh.f32 %v860_v10  ;;  %v859_v17 = vadd.f32 %v855_v14, %v2283_v13  ;;  %v2063_v10 = vmov 0.0  }
 0x60f   :  { %2032 = vtanh.f32 %v859_v17 }
 0x610   :  { %2034 = vtanh.f32 %v858_v16 }
 0x611   :  { %2036 = vtanh.f32 %v857_v18 }
 0x61a   :  { %v2484_v39 = vpop.eup %2030 }
 0x61b   :  { %1935 = vmatprep.subr.mxu1 %v2484_v39 }
 0x61c   :  { %v2487_v40 = vpop.eup %2032  ;;  %1936 = vmatpush3.msra.mxu1 %v2484_v39 }
 0x61d   :  { %1937 = vmatprep.subr.mxu1 %v2487_v40  ;;  %v2491_v50 = vpop.eup %2034 }
 0x61e   :  { %1938 = vmatpush3.msra.mxu1 %v2487_v40  ;;  %v2495_v0 = vpop.eup %2036 }
 0x61f   :  { %1939 = vmatprep.subr.mxu1 %v2491_v50 }
 0x620   :  { %1940 = vmatpush3.msra.mxu1 %v2491_v50 }
 0x621   :  { %1941 = vmatprep.subr.mxu1 %v2495_v0 }
 0x622   :  { %1942 = vmatpush3.msra.mxu1 %v2495_v0 }
 0x623   :  { %1944 = vmatmul.mubr.msk.f32.vlgmr.msra.gmra.mxu1 %vm95_vm0, %v2149_v11 }
 0x624   :  { %1946 = vmatprep.mubr.msk.f32.mxu1 %vm95_vm0, %v2154_v12 }
 0x627   :  { %1947 = vmatmul.mubr.msk.f32.gmra.mxu1 %vm95_vm0, %v2169_v15 }
 0x628   :  { %1971 = vmatprep.mubr.msk.f32.mxu1 %vm95_vm0, %v2122_v4 }
 0x6e3   :  { %v1945_v19 = vpop.f32.mrf.mxu1 }
 0x6e4   :  { %v964_v23 = vadd.f32 %v1945_v19, %v2226_v41 }
 0x6e5   :  { %v944_v20 = vpop.f32.mrf.mxu1 }
 0x6e6   :  { %v963_v25 = vadd.f32 %v944_v20, %v2272_v1  ;;  %v968_v8 = vadd.f32 %v964_v23, %v2286_v29 }
 0x6e7   :  { %v1948_v21 = vpop.f32.mrf.mxu1 }
 0x6e8   :  { %v966_v59 = vadd.f32 %v1948_v21, %v2228_v42  ;;  %v967_v4 = vadd.f32 %v963_v25, %v2290_v22 }
 0x6e9   :  { %v954_v30 = vpop.f32.mrf.mxu1 }
 0x6ea   :  { %v970_v43 = vadd.f32 %v966_v59, %v2278_v5  ;;  %v965_v7 = vadd.f32 %v954_v30, %v2248_v51 }
 0x6ec   :  { %2038 = vtanh.f32 %v970_v43  ;;  %v969_v9 = vadd.f32 %v965_v7, %v2283_v13 }
 0x6ee   :  { %2040 = vtanh.f32 %v969_v9 }
 0x6ef   :  { %2042 = vtanh.f32 %v968_v8 }
 0x6f0   :  { %2044 = vtanh.f32 %v967_v4 }
 0x6f9   :  { %v2516_v41 = vpop.eup %2038 }
 0x6fa   :  { %1949 = vmatprep.subr.mxu0 %v2516_v41 }
 0x6fb   :  { %v2519_v42 = vpop.eup %2040  ;;  %1950 = vmatpush3.msra.mxu0 %v2516_v41 }
 0x6fc   :  { %1951 = vmatprep.subr.mxu0 %v2519_v42  ;;  %v2523_v51 = vpop.eup %2042 }
 0x6fd   :  { %1952 = vmatpush3.msra.mxu0 %v2519_v42  ;;  %v2527_v1 = vpop.eup %2044 }
 0x6fe   :  { %1953 = vmatprep.subr.mxu0 %v2523_v51 }
 0x6ff   :  { %1954 = vmatpush3.msra.mxu0 %v2523_v51 }
 0x700   :  { %1955 = vmatprep.subr.mxu0 %v2527_v1 }
 0x701   :  { %1956 = vmatpush3.msra.mxu0 %v2527_v1 }
 0x702   :  { %1958 = vmatmul.mubr.msk.f32.vlgmr.msra.gmra.mxu0 %vm95_vm0, %v2149_v11  ;;  %1281 = vmatprep.subr.mxu0 %v2324_v24 }
 0x703   :  { %1282 = vmatpush1.msra.mxu0 %v2293_v38  ;;  %1960 = vmatprep.mubr.msk.f32.mxu0 %vm95_vm0, %v2154_v12  ;;  %v2547_v38 = vld [vmem:[%s2653_s5] sm:$0x1] }
 0x704   :  { %1283 = vmatprep.subr.mxu0 %v2327_v26 }
 0x705   :  { %1284 = vmatpush1.msra.mxu0 %v2296_v47 }
 0x706   :  { %1961 = vmatmul.mubr.msk.f32.gmra.mxu0 %vm95_vm0, %v2169_v15  ;;  %1285 = vmatprep.subr.mxu0 %v2331_v31 }
 0x707   :  { %1286 = vmatpush1.msra.mxu0 %v2300_v56  ;;  %1321 = vmatprep.mubr.f32.mxu0 %v2063_v10 }
 0x708   :  { %1287 = vmatprep.subr.mxu0 %v2335_v44 }
 0x709   :  { %1288 = vmatpush1.msra.mxu0 %v2304_v6 }
 0x70a   :  { %1752 = vmatmul.mubr.msk.f32.vlgmr.msra.gmra.mxu0 %vm95_vm0, %v2547_v38  ;;  %1423 = vmatprep.subr.mxu0 %v2452_v36 }
 0x70b   :  { %1424 = vmatpush1.msra.mxu0 %v2420_v34  ;;  %1463 = vmatprep.mubr.f32.mxu0 %v2063_v10 }
 0x70c   :  { %1425 = vmatprep.subr.mxu0 %v2455_v37 }
 0x70d   :  { %1426 = vmatpush1.msra.mxu0 %v2423_v35 }
 0x70e   :  { %1427 = vmatprep.subr.mxu0 %v2459_v49 }
 0x70f   :  { %1428 = vmatpush1.msra.mxu0 %v2427_v48 }
 0x710   :  { %1429 = vmatprep.subr.mxu0 %v2463_v63 }
 0x711   :  { %1430 = vmatpush1.msra.mxu0 %v2431_v62 }
 0x712   :  { %1754 = vmatmul.mubr.msk.f32.vlgmr.msra.gmra.mxu0 %vm95_vm0, %v2547_v38 }
 0x713   :  { %1605 = vmatprep.mubr.f32.mxu0 %v2063_v10 }
 0x7c2   :  { %v1959_v47 = vpop.f32.mrf.mxu0 }
 0x7c3   :  { %v1074_v24 = vadd.f32 %v1959_v47, %v2250_v52 }
 0x7c4   :  { %v1054_v56 = vpop.f32.mrf.mxu0 }
 0x7c5   :  { %v1073_v44 = vadd.f32 %v1054_v56, %v2274_v2  ;;  %v1078_v48 = vadd.f32 %v1074_v24, %v2286_v29 }
 0x7c6   :  { %v1962_v6 = vpop.f32.mrf.mxu0 }
 0x7c7   :  { %v1076_v26 = vadd.f32 %v1962_v6, %v2252_v53  ;;  %v1077_v36 = vadd.f32 %v1073_v44, %v2290_v22 }
 0x7c8   :  { %v1064_v31 = vpop.f32.mrf.mxu0 }
 0x7c9   :  { %v1080_v34 = vadd.f32 %v1076_v26, %v2278_v5  ;;  %v1075_v35 = vadd.f32 %v1064_v31, %v2254_v54 }
 0x7cb   :  { %2046 = vtanh.f32 %v1080_v34  ;;  %v1079_v62 = vadd.f32 %v1075_v35, %v2283_v13 }
 0x7cd   :  { %2048 = vtanh.f32 %v1079_v62 }
 0x7ce   :  { %2050 = vtanh.f32 %v1078_v48 }
 0x7cf   :  { %2052 = vtanh.f32 %v1077_v36 }
 0x7d8   :  { %v2571_v52 = vpop.eup %2046 }
 0x7d9   :  { %1963 = vmatprep.subr.mxu1 %v2571_v52 }
 0x7da   :  { %v2574_v53 = vpop.eup %2048  ;;  %1964 = vmatpush3.msra.mxu1 %v2571_v52 }
 0x7db   :  { %1965 = vmatprep.subr.mxu1 %v2574_v53  ;;  %v2578_v54 = vpop.eup %2050 }
 0x7dc   :  { %1966 = vmatpush3.msra.mxu1 %v2574_v53  ;;  %v2582_v2 = vpop.eup %2052 }
 0x7dd   :  { %1967 = vmatprep.subr.mxu1 %v2578_v54 }
 0x7de   :  { %1968 = vmatpush3.msra.mxu1 %v2578_v54 }
 0x7df   :  { %1969 = vmatprep.subr.mxu1 %v2582_v2 }
 0x7e0   :  { %1970 = vmatpush3.msra.mxu1 %v2582_v2 }
 0x7e1   :  { %1972 = vmatmul.mubr.msk.f32.vlgmr.msra.gmra.mxu1 %vm95_vm0, %v2149_v11  ;;  %1352 = vmatprep.subr.mxu1 %v2388_v33  ;;  %v1250_v11 = vlaneseq }
 0x7e2   :  { %1353 = vmatpush1.msra.mxu1 %v2356_v32  ;;  %1974 = vmatprep.mubr.msk.f32.mxu1 %vm95_vm0, %v2154_v12 }
 0x7e3   :  { %1354 = vmatprep.subr.mxu1 %v2391_v28  ;;  %vm1691_vm1 = vcmp.lt.s32.totalorder %v1250_v11, 256 }
 0x7e4   :  { %1355 = vmatpush1.msra.mxu1 %v2359_v27  ;;  %v1323_v27 = vpop.f32.mrf.mxu0 }
 0x7e5   :  { %1975 = vmatmul.mubr.msk.f32.gmra.mxu1 %vm95_vm0, %v2169_v15  ;;  %1356 = vmatprep.subr.mxu1 %v2395_v46  ;;  %v1251_v15 = vshrl.u32 %v1250_v11, 7 }
 0x7e6   :  { %1357 = vmatpush1.msra.mxu1 %v2363_v45  ;;  %1392 = vmatprep.mubr.f32.mxu1 %v2063_v10  ;;  %v1325_v63 = vpop.f32.mrf.mxu0 }
 0x7e7   :  { %1358 = vmatprep.subr.mxu1 %v2399_v61  ;;  %v1252_v46 = vsub.s32 0, %v1251_v15  ;;  %v1248_v61 = vpop.permute.xlu0 %1247 }
 0x7e8   :  { %1359 = vmatpush1.msra.mxu1 %v2367_v60  ;;  %v1465_v17 = vpop.f32.mrf.mxu0 }
 0x7e9   :  { %1753 = vmatmul.mubr.msk.f32.vlgmr.msra.gmra.mxu1 %vm95_vm0, %v2547_v38  ;;  %1494 = vmatprep.subr.mxu1 %v2516_v41 }
 0x7ea   :  { %1495 = vmatpush1.msra.mxu1 %v2484_v39  ;;  %1534 = vmatprep.mubr.f32.mxu1 %v2063_v10 }
 0x7eb   :  { %1496 = vmatprep.subr.mxu1 %v2519_v42 }
 0x7ec   :  { %1497 = vmatpush1.msra.mxu1 %v2487_v40 }
 0x7ed   :  { %1498 = vmatprep.subr.mxu1 %v2523_v51 }
 0x7ee   :  { %1499 = vmatpush1.msra.mxu1 %v2491_v50 }
 0x7ef   :  { %1500 = vmatprep.subr.mxu1 %v2527_v1 }
 0x7f0   :  { %1501 = vmatpush1.msra.mxu1 %v2495_v0  ;;  %v1467_v0 = vpop.f32.mrf.mxu0 }
 0x7f1   :  { %1755 = vmatmul.mubr.msk.f32.vlgmr.msra.gmra.mxu1 %vm95_vm0, %v2547_v38 }
 0x8a1   :  { %v1973_v12 = vpop.f32.mrf.mxu1 }
 0x8a2   :  { %v1184_v32 = vadd.f32 %v1973_v12, %v2256_v55 }
 0x8a3   :  { %v1164_v45 = vpop.f32.mrf.mxu1 }
 0x8a4   :  { %v1188_v60 = vadd.f32 %v1184_v32, %v2286_v29  ;;  %v1183_v33 = vadd.f32 %v1164_v45, %v2276_v3  ;;  %v2064_v29 = vmov 1966171168   ;;  %v1253_v3 = vrot.slane %v1248_v61, %v1252_v46 }
 0x8a5   :  { %v1976_v28 = vpop.f32.mrf.mxu1  ;;  %v1627_v39 = vunpack.c.l.s4 %v2064_v29 }
 0x8a6   :  { %2054 = vtanh.f32 %v1188_v60  ;;  %v1187_v37 = vadd.f32 %v1183_v33, %v2290_v22  ;;  %v1186_v49 = vadd.f32 %v1976_v28, %v2258_v57  ;;  %v1326_v19 = vadd.f32 %v1325_v63, %v1253_v3 }
 0x8a7   :  { %v1174_v14 = vpop.f32.mrf.mxu1  ;;  %v1628_v57 = vunpack.c.0.s8 %v1627_v39  ;;  %v1324_v21 = vadd.f32 %v1323_v27, %v1253_v3  ;;  %v1468_v23 = vadd.f32 %v1467_v0, %v1253_v3  ;;  %v1466_v25 = vadd.f32 %v1465_v17, %v1253_v3 }
 0x8a8   :  { %2056 = vtanh.f32 %v1187_v37  ;;  %v1190_v16 = vadd.f32 %v1186_v49, %v2278_v5  ;;  %v1185_v55 = vadd.f32 %v1174_v14, %v2260_v58 }
 0x8a9   :  { %v1394_v18 = vpop.f32.mrf.mxu1  ;;  %v1631_v58 = vsub.s32 %v1628_v57, %v1251_v15  ;;  %v1622_v30 = vcombine.low %v1324_v21, %v1326_v19  ;;  %v1624_v8 = vcombine.low %v1466_v25, %v1468_v23 }
 0x8aa   :  { %2058 = vtanh.f32 %v1190_v16  ;;  %v1189_v40 = vadd.f32 %v1185_v55, %v2283_v13  ;;  %v1395_v20 = vadd.f32 %v1394_v18, %v1253_v3 }
 0x8ab   :  { %v1396_v50 = vpop.f32.mrf.mxu1  ;;  %v1632_v42 = vrot.slane %v1622_v30, %v1631_v58  ;;  %v1646_v10 = vrot.slane %v1624_v8, %v1631_v58 }
 0x8ac   :  { %2060 = vtanh.f32 %v1189_v40  ;;  %v1397_v22 = vadd.f32 %v1396_v50, %v1253_v3 }
 0x8ae   :  { %v1623_v5 = vcombine.low %v1395_v20, %v1397_v22 }
 0x8b0   :  { %v1639_v13 = vrot.slane %v1623_v5, %v1631_v58 }
 0x8b1   :  { %v1536_v59 = vpop.f32.mrf.mxu1 }
 0x8b2   :  { %v1537_v9 = vadd.f32 %v1536_v59, %v1253_v3  ;;  %v1654_v47 = vcombine.low %v1632_v42, %v1639_v13 }
 0x8b3   :  { %v2055_v43 = vpop.eup %2054  ;;  %v1538_v7 = vpop.f32.mrf.mxu1 }
 0x8b4   :  { %1200 = vst [vmem:[%s2654_s8 + $0x8] sm:$0xff] %v2055_v43  ;;  %v1539_v4 = vadd.f32 %v1538_v7, %v1253_v3  ;;  %v1662_v26 = vrot.slane %v1654_v47, %v1631_v58 }
 0x8b5   :  { %v2057_v41 = vpop.eup %2056 }
 0x8b6   :  { %1199 = vst [vmem:[%s2654_s8] sm:$0xff] %v2057_v41  ;;  %v1625_v51 = vcombine.low %v1537_v9, %v1539_v4 }
 0x8b7   :  { %v2059_v1 = vpop.eup %2058 }
 0x8b8   :  { %1202 = vst [vmem:[%s2654_s8 + $0x18] sm:$0xff] %v2059_v1  ;;  %v1653_v56 = vrot.slane %v1625_v51, %v1631_v58  ;;  %1565 = vmatprep.subr.mxu0 %v2059_v1 }
 0x8b9   :  { %v2061_v6 = vpop.eup %2060  ;;  %1566 = vmatpush1.msra.mxu0 %v2571_v52 }
 0x8ba   :  { %1201 = vst [vmem:[%s2654_s8 + $0x10] sm:$0xff] %v2061_v6  ;;  %v1655_v24 = vcombine.low %v1646_v10, %v1653_v56  ;;  %1567 = vmatprep.subr.mxu0 %v2061_v6 }
 0x8bb   :  { %1568 = vmatpush1.msra.mxu0 %v2574_v53 }
 0x8bc   :  { %v1669_v31 = vrot.slane %v1655_v24, %v1631_v58  ;;  %1569 = vmatprep.subr.mxu0 %v2055_v43 }
 0x8bd   :  { %1570 = vmatpush1.msra.mxu0 %v2578_v54 }
 0x8be   :  { %v1670_v44 = vcombine.low %v1662_v26, %v1669_v31  ;;  %1571 = vmatprep.subr.mxu0 %v2057_v41 }
 0x8bf   :  { %1572 = vmatpush1.msra.mxu0 %v2582_v2 }
 0x8c0   :  { %1688 = vst [vmem:[%s2655_s7] sm:$0xff] %v1670_v44  ;;  %1756 = vmatmul.mubr.msk.f32.vlgmr.msra.gmra.mxu0 %vm95_vm0, %v2547_v38 }
 0x980   :  { %v1607_v34 = vpop.f32.mrf.mxu0 }
 0x981   :  { %v1608_v48 = vadd.f32 %v1607_v34, %v1253_v3 }
 0x982   :  { %v1609_v35 = vpop.f32.mrf.mxu0 }
 0x983   :  { %v1610_v62 = vadd.f32 %v1609_v35, %v1253_v3 }
 0x985   :  { %v1671_v36 = vcombine.low %v1608_v48, %v1610_v62 }
 0x987   :  { %v1678_v52 = vrot.slane %v1671_v36, %v1631_v58 }
 0x989   :  { %v1685_v53 = vrot.slane %v1678_v52, %v1631_v58 }
 0x98b   :  { %1693 = vst.msk [vmem:[%s2655_s7 + $0x8] sm:$0x3] %vm1691_vm1, %v1685_v53 }

</bundles_post_ra>
